<compile_context>
chip_gen: v6e
topology: v6e:2x2x1
jax: 0.10.0
libtpu: 0.0.40
codegen_flags: <defaults>
</compile_context>

<pallas_src>
import functools

import jax
import jax.numpy as jnp
import numpy as np
from jax.experimental import pallas as pl
from jax.experimental.pallas import tpu as pltpu


def _elu_plus_one(x):
    # F.elu(x) + 1 == where(x > 0, x + 1, exp(x)); exp runs on the EUP slot.
    return jnp.where(x > 0, x + 1.0, jnp.exp(x))


def _linear_attention_kernel(q_ref, k_ref, v_ref, mask_ref, o_ref, w_ref, *,
                             eps, hd, s_len, mxu_dtype, approx_recip):
    """One grid step = (batch n, L-parallel slice p, L tile l); all H heads.

    Blocks:  q_ref/o_ref (1, TL, H*D), k_ref/v_ref (1, S, H*D),
             mask_ref (H*D, H*D) block-diagonal 0/1 constant (DMA'd once).
    Scratch: w_ref (H*D, 2*H*D), persistent across the innermost L axis.
    """
    li = pl.program_id(2)

    # ---- once per (batch row, core slice): build W ---------------------------
    @pl.when(li == 0)
    def _():
        kmap32 = _elu_plus_one(k_ref[0].astype(jnp.float32))           # (S, HD) f32
        # Denominator half: f32 Ksum on the XLU reduce slot, pre-scaled by 1/S
        # so the (possibly bf16) W copy stays well conditioned.
        ksum_col = (jnp.sum(kmap32, axis=0, keepdims=True)
                    * (1.0 / s_len)).T                                  # (HD, 1) f32
        # Numerator half: one MXU pass K^T V; cross-head terms masked out below.
        ktv = jax.lax.dot_general(
            kmap32.astype(mxu_dtype), v_ref[0].astype(mxu_dtype),
            (((0,), (0,)), ((), ())),
            preferred_element_type=jnp.float32)                         # (HD, HD) f32
        mask = mask_ref[...]                                            # (HD, HD) 0/1 f32
        w_ref[:, :hd] = (ktv * mask).astype(w_ref.dtype)
        w_ref[:, hd:] = (ksum_col * mask).astype(w_ref.dtype)

    # ---- every L tile: one lane-dense MXU matmul -> numerator and denominator
    qmap = _elu_plus_one(q_ref[0])                                      # (TL, HD)
    r = jnp.dot(qmap.astype(mxu_dtype), w_ref[...],
                preferred_element_type=jnp.float32)                     # (TL, 2*HD)
    num = r[:, :hd]                     # per-head Q_h @ (K_h^T V_h), output layout
    den = r[:, hd:] * s_len + eps       # undo the 1/S pre-scaling, add eps (as ref)
    # Padded rows of a partial tile may be inf/NaN here; they are masked on store.
    o_ref[0] = (num * pl.reciprocal(den, approx=approx_recip)).astype(o_ref.dtype)


def _vmem_capacity_bytes():
    try:
        return int(pltpu.get_tpu_info().vmem_capacity_bytes)
    except Exception:
        return 64 * 1024 * 1024   # most restrictive per-core VMEM (v7x)


def linear_attention(queries, keys, values, eps: float = 1e-6,
                     *, mxu_dtype=jnp.bfloat16, block_l: int = 1024):
    """Pallas implementation of LinearAttention.forward.

    Args:
        queries: [N, L, H, D]
        keys:    [N, S, H, D]
        values:  [N, S, H, D]
        mxu_dtype: dtype fed to the MXU.  Default bf16 (recommended on v6e/v7x);
            pass jnp.float32 for the high-precision path.  Accumulation is f32
            either way.
    Returns:
        queried_values: [N, L, H, D]
    """
    N, L, H, D = queries.shape
    _, S, _, _ = keys.shape
    HD = H * D
    in_dtype = queries.dtype
    if mxu_dtype is None:
        mxu_dtype = in_dtype

    # Free reshapes (trailing dims contiguous): no transpose HBM passes.
    q = queries.reshape(N, L, HD)
    k = keys.reshape(N, S, HD)
    v = values.reshape(N, S, HD)
    # NOTE: lane-dense design assumes HD = H*D is a multiple of 128.  Other HD
    # is still correct (blocks use the full extent) but pays masked stores and
    # lane-relayout slices.

    tl = L if L <= block_l else block_l
    nl = pl.cdiv(L, tl)
    # Megacore: if N alone can't fill both TensorCores (odd N), also split L in
    # two "parallel" halves; W is rebuilt per core slice (one extra small matmul).
    lp = 2 if (N % 2 == 1 and nl >= 2 and nl % 2 == 0) else 1
    nli = nl // lp

    # Block-diagonal head mask, built host-side once; constant block index so it
    # is DMA'd exactly once.
    head_of = np.arange(HD) // D
    mask = jnp.asarray((head_of[:, None] == head_of[None, :]).astype(np.float32))

    # ---- VMEM budget (per generation, via get_tpu_info with a safe fallback) --
    bpe_in = jnp.dtype(in_dtype).itemsize
    bpe_m = jnp.dtype(mxu_dtype).itemsize
    cap = _vmem_capacity_bytes()

    kv_block = S * HD * bpe_in
    # K/V block index only changes with n -> single-buffer them when VMEM-tight
    # (trades an exposed DMA at n-boundaries for half the K/V VMEM).
    kv_buffers = 2 if (2 * 2 * kv_block) <= cap // 2 else 1
    needed = (
        2 * 2 * tl * HD * bpe_in                 # Q + O blocks, double-buffered
        + 2 * kv_buffers * kv_block              # K + V slabs
        + 2 * HD * HD * 4                        # mask input
        + HD * 2 * HD * bpe_m                    # W scratch
        + S * HD * (4 + bpe_m)                   # kmap (f32) + MXU cast
        + 2 * HD * HD * 4                        # ktv / masked temporaries
        + tl * HD * (4 + bpe_m) + tl * 2 * HD * 4  # qmap, cast, r
    )
    vmem_limit = int(min(max(int(needed * 1.3) + (8 << 20), 32 << 20),
                         int(cap * 0.85)))

    kv_pipe = {} if kv_buffers == 2 else {"pipeline_mode": pl.Buffered(1)}

    kernel = functools.partial(
        _linear_attention_kernel, eps=float(eps), hd=HD, s_len=float(S),
        mxu_dtype=mxu_dtype,
        approx_recip=(jnp.dtype(mxu_dtype) != jnp.dtype(jnp.float32)))

    out = pl.pallas_call(
        kernel,
        out_shape=jax.ShapeDtypeStruct((N, L, HD), in_dtype),
        grid_spec=pltpu.PrefetchScalarGridSpec(
            num_scalar_prefetch=0,
            grid=(N, lp, nli),
            in_specs=[
                pl.BlockSpec((1, tl, HD), lambda n, p, l: (n, p * nli + l, 0)),
                pl.BlockSpec((1, S, HD), lambda n, p, l: (n, 0, 0), **kv_pipe),
                pl.BlockSpec((1, S, HD), lambda n, p, l: (n, 0, 0), **kv_pipe),
                pl.BlockSpec((HD, HD), lambda n, p, l: (0, 0)),
            ],
            out_specs=pl.BlockSpec((1, tl, HD), lambda n, p, l: (n, p * nli + l, 0)),
            scratch_shapes=[pltpu.VMEM((HD, 2 * HD), mxu_dtype)],
        ),
        compiler_params=pltpu.CompilerParams(
            dimension_semantics=("parallel", "parallel", "arbitrary"),
            vmem_limit_bytes=vmem_limit,
        ),
    )(q, k, v, mask)

    return out.reshape(N, L, H, D)


def _reference(queries, keys, values, eps: float = 1e-6):
    """Pure-JAX reference matching the PyTorch module semantics."""
    Q = jax.nn.elu(queries) + 1.0
    K = jax.nn.elu(keys) + 1.0
    v_length = values.shape[1]
    values = values / v_length
    KV = jnp.einsum('nshd,nshv->nhdv', K, values)
    Z = 1.0 / (jnp.einsum('nlhd,nhd->nlh', Q, K.sum(axis=1)) + eps)
    return jnp.einsum('nlhd,nhdv,nlh->nlhv', Q, KV, Z) * v_length


if __name__ == "__main__":
    key = jax.random.PRNGKey(0)
    kq, kk, kv = jax.random.split(key, 3)

    N, L, S, H, D = 2, 16, 8, 4, 32      # H*D = 128 -> lane-dense tiles
    queries = jax.random.normal(kq, (N, L, H, D), dtype=jnp.float32)
    keys = jax.random.normal(kk, (N, S, H, D), dtype=jnp.float32)
    values = jax.random.normal(kv, (N, S, H, D), dtype=jnp.float32)

    ref = _reference(queries, keys, values)

    # Default path: bf16 MXU inputs, f32 accumulation (v6e/v7x throughput path).
    out = jax.block_until_ready(linear_attention(queries, keys, values))
    assert out.shape == (N, L, H, D), out.shape
    assert jnp.allclose(out, ref, atol=2e-2, rtol=2e-2), (
        "bf16 path mismatch vs reference, max abs err = "
        f"{float(jnp.max(jnp.abs(out - ref)))}")

    # High-precision path: f32 MXU + exact (non-approx) reciprocal.
    out_f32 = jax.block_until_ready(
        linear_attention(queries, keys, values, mxu_dtype=jnp.float32))
    assert jnp.allclose(out_f32, ref, atol=1e-3, rtol=1e-3), (
        "f32 path mismatch vs reference, max abs err = "
        f"{float(jnp.max(jnp.abs(out_f32 - ref)))}")

    # Odd-N case: exercises the extra "parallel" L-split (grid (1, 2, L//tl/2)).
    out_n1 = jax.block_until_ready(
        linear_attention(queries[:1], keys[:1], values[:1],
                         mxu_dtype=jnp.float32, block_l=8))
    assert jnp.allclose(out_n1, ref[:1], atol=1e-3, rtol=1e-3), (
        "split-L path mismatch vs reference, max abs err = "
        f"{float(jnp.max(jnp.abs(out_n1 - ref[:1])))}")

    print("KERNEL_OK")
</pallas_src>

<mosaic_0001>
module attributes {stable_mosaic.version = 11 : i64} {
  func.func @_linear_attention_kernel(%arg0: i32, %arg1: i32, %arg2: i32, %arg3: memref<1x16x128xf32, #tpu.memory_space<vmem>>, %arg4: memref<1x8x128xf32, #tpu.memory_space<vmem>>, %arg5: memref<1x8x128xf32, #tpu.memory_space<vmem>>, %arg6: memref<128x128xf32, #tpu.memory_space<vmem>>, %arg7: memref<1x16x128xf32, #tpu.memory_space<vmem>>, %arg8: memref<128x256xbf16, #tpu.memory_space<vmem>>) attributes {dimension_semantics = [#tpu.dimension_semantics<parallel>, #tpu.dimension_semantics<parallel>, #tpu.dimension_semantics<arbitrary>], iteration_bounds = array<i64: 2, 1, 1>, scalar_prefetch = 0 : i64, scratch_operands = 1 : i64, tpu.core_type = #tpu.core_type<tc>, window_params = [{transform_indices = @transform_0, window_bounds = array<i64: 1, 16, 128>}, {transform_indices = @transform_1, window_bounds = array<i64: 1, 8, 128>}, {transform_indices = @transform_2, window_bounds = array<i64: 1, 8, 128>}, {pipeline_mode = #tpu.pipeline_mode<synchronous>, transform_indices = @transform_3, window_bounds = array<i64: 128, 128>}, {transform_indices = @transform_4, window_bounds = array<i64: 1, 16, 128>}]} {
    %c0_i32 = arith.constant 0 : i32
    %0 = arith.cmpi eq, %arg2, %c0_i32 : i32
    %1 = arith.extui %0 : i1 to i32
    %c0_i32_0 = arith.constant 0 : i32
    %2 = arith.cmpi ne, %1, %c0_i32_0 : i32
    scf.if %2 {
      %c0_12 = arith.constant 0 : index
      %c0_13 = arith.constant 0 : index
      %c0_14 = arith.constant 0 : index
      %25 = vector.load %arg4[%c0_12, %c0_13, %c0_14] : memref<1x8x128xf32, #tpu.memory_space<vmem>>, vector<1x8x128xf32>
      %26 = vector.shape_cast %25 : vector<1x8x128xf32> to vector<8x128xf32>
      %cst_15 = arith.constant 0.000000e+00 : f32
      %27 = vector.broadcast %cst_15 : f32 to vector<8x128xf32>
      %28 = arith.cmpf ogt, %26, %27 : vector<8x128xf32>
      %cst_16 = arith.constant 1.000000e+00 : f32
      %29 = vector.broadcast %cst_16 : f32 to vector<8x128xf32>
      %30 = arith.addf %26, %29 : vector<8x128xf32>
      %31 = math.exp %26 : vector<8x128xf32>
      %32 = arith.select %28, %30, %31 : vector<8x128xi1>, vector<8x128xf32>
      %cst_17 = arith.constant dense<0.000000e+00> : vector<128xf32>
      %33 = vector.multi_reduction <add>, %32, %cst_17 [0] : vector<8x128xf32> to vector<128xf32>
      %34 = vector.shape_cast %33 : vector<128xf32> to vector<1x128xf32>
      %cst_18 = arith.constant 1.250000e-01 : f32
      %35 = vector.broadcast %cst_18 : f32 to vector<1x128xf32>
      %36 = arith.mulf %34, %35 : vector<1x128xf32>
      %37 = tpu.transpose %36, [1, 0] : vector<1x128xf32> -> vector<128x1xf32>
      %38 = arith.truncf %32 : vector<8x128xf32> to vector<8x128xbf16>
      %c0_19 = arith.constant 0 : index
      %c0_20 = arith.constant 0 : index
      %c0_21 = arith.constant 0 : index
      %39 = vector.load %arg5[%c0_19, %c0_20, %c0_21] : memref<1x8x128xf32, #tpu.memory_space<vmem>>, vector<1x8x128xf32>
      %40 = vector.shape_cast %39 : vector<1x8x128xf32> to vector<8x128xf32>
      %41 = arith.truncf %40 : vector<8x128xf32> to vector<8x128xbf16>
      %cst_22 = arith.constant dense<0.000000e+00> : vector<128x128xf32>
      %42 = tpu.matmul %38, %41, %cst_22 {dimension_numbers = #tpu.dot_dimension_numbers<[0], [0], [1], [1], [0, 1, 1, 1], [], []>} : vector<8x128xbf16>, vector<8x128xbf16>, vector<128x128xf32> -> vector<128x128xf32>
      %c0_23 = arith.constant 0 : index
      %c0_24 = arith.constant 0 : index
      %43 = vector.load %arg6[%c0_23, %c0_24] : memref<128x128xf32, #tpu.memory_space<vmem>>, vector<128x128xf32>
      %44 = arith.mulf %42, %43 : vector<128x128xf32>
      %45 = arith.truncf %44 : vector<128x128xf32> to vector<128x128xbf16>
      %c0_25 = arith.constant 0 : index
      %c0_26 = arith.constant 0 : index
      %46 = vector.load %arg8[%c0_25, %c0_26] : memref<128x256xbf16, #tpu.memory_space<vmem>>, vector<128x128xbf16>
      tpu.vector_store %arg8[%c0_25, %c0_26], %45 {strides = array<i32>} : memref<128x256xbf16, #tpu.memory_space<vmem>>, vector<128x128xbf16>,
      %47 = vector.broadcast %37 : vector<128x1xf32> to vector<128x128xf32>
      %48 = arith.mulf %47, %43 : vector<128x128xf32>
      %49 = arith.truncf %48 : vector<128x128xf32> to vector<128x128xbf16>
      %c0_27 = arith.constant 0 : index
      %c128 = arith.constant 128 : index
      %50 = vector.load %arg8[%c0_27, %c128] : memref<128x256xbf16, #tpu.memory_space<vmem>>, vector<128x128xbf16>
      tpu.vector_store %arg8[%c0_27, %c128], %49 {strides = array<i32>} : memref<128x256xbf16, #tpu.memory_space<vmem>>, vector<128x128xbf16>,
    } else {
    }
    %c0 = arith.constant 0 : index
    %c0_1 = arith.constant 0 : index
    %c0_2 = arith.constant 0 : index
    %3 = vector.load %arg3[%c0, %c0_1, %c0_2] : memref<1x16x128xf32, #tpu.memory_space<vmem>>, vector<1x16x128xf32>
    %4 = vector.shape_cast %3 : vector<1x16x128xf32> to vector<16x128xf32>
    %cst = arith.constant 0.000000e+00 : f32
    %5 = vector.broadcast %cst : f32 to vector<16x128xf32>
    %6 = arith.cmpf ogt, %4, %5 : vector<16x128xf32>
    %cst_3 = arith.constant 1.000000e+00 : f32
    %7 = vector.broadcast %cst_3 : f32 to vector<16x128xf32>
    %8 = arith.addf %4, %7 : vector<16x128xf32>
    %9 = math.exp %4 : vector<16x128xf32>
    %10 = arith.select %6, %8, %9 : vector<16x128xi1>, vector<16x128xf32>
    %11 = arith.truncf %10 : vector<16x128xf32> to vector<16x128xbf16>
    %c0_4 = arith.constant 0 : index
    %c0_5 = arith.constant 0 : index
    %12 = vector.load %arg8[%c0_4, %c0_5] : memref<128x256xbf16, #tpu.memory_space<vmem>>, vector<128x256xbf16>
    %cst_6 = arith.constant dense<0.000000e+00> : vector<16x256xf32>
    %13 = tpu.matmul %11, %12, %cst_6 {dimension_numbers = #tpu.dot_dimension_numbers<[1], [0], [0], [1], [0, 0, 1, 1], [], []>} : vector<16x128xbf16>, vector<128x256xbf16>, vector<16x256xf32> -> vector<16x256xf32>
    %14 = vector.extract_strided_slice %13 {offsets = [0, 0], sizes = [16, 128], strides = [1, 1]} : vector<16x256xf32> to vector<16x128xf32>
    %15 = vector.extract_strided_slice %13 {offsets = [0, 128], sizes = [16, 128], strides = [1, 1]} : vector<16x256xf32> to vector<16x128xf32>
    %cst_7 = arith.constant 8.000000e+00 : f32
    %16 = vector.broadcast %cst_7 : f32 to vector<16x128xf32>
    %17 = arith.mulf %15, %16 : vector<16x128xf32>
    %cst_8 = arith.constant 9.99999997E-7 : f32
    %18 = vector.broadcast %cst_8 : f32 to vector<16x128xf32>
    %19 = arith.addf %17, %18 : vector<16x128xf32>
    %20 = tpu.reciprocal %19 {approx = true} : vector<16x128xf32> -> vector<16x128xf32>
    %21 = arith.mulf %14, %20 : vector<16x128xf32>
    %c0_9 = arith.constant 0 : index
    %c0_10 = arith.constant 0 : index
    %c0_11 = arith.constant 0 : index
    %22 = vector.load %arg7[%c0_9, %c0_10, %c0_11] : memref<1x16x128xf32, #tpu.memory_space<vmem>>, vector<1x16x128xf32>
    %23 = vector.shape_cast %22 : vector<1x16x128xf32> to vector<16x128xf32>
    %24 = vector.shape_cast %21 : vector<16x128xf32> to vector<1x16x128xf32>
    tpu.vector_store %arg7[%c0_9, %c0_10, %c0_11], %24 {strides = array<i32>} : memref<1x16x128xf32, #tpu.memory_space<vmem>>, vector<1x16x128xf32>,
    return
  }
  func.func @transform_0(%arg0: i32, %arg1: i32, %arg2: i32) -> (i32, i32, i32) {
    %c1_i32 = arith.constant 1 : i32
    %0 = arith.muli %arg1, %c1_i32 : i32
    %1 = arith.addi %0, %arg2 : i32
    %c0_i32 = arith.constant 0 : i32
    %c0_i32_0 = arith.constant 0 : i32
    return %arg0, %1, %c0_i32 : i32, i32, i32
  }
  func.func @transform_1(%arg0: i32, %arg1: i32, %arg2: i32) -> (i32, i32, i32) {
    %c0_i32 = arith.constant 0 : i32
    %c0_i32_0 = arith.constant 0 : i32
    %c0_i32_1 = arith.constant 0 : i32
    return %arg0, %c0_i32, %c0_i32_0 : i32, i32, i32
  }
  func.func @transform_2(%arg0: i32, %arg1: i32, %arg2: i32) -> (i32, i32, i32) {
    %c0_i32 = arith.constant 0 : i32
    %c0_i32_0 = arith.constant 0 : i32
    %c0_i32_1 = arith.constant 0 : i32
    return %arg0, %c0_i32, %c0_i32_0 : i32, i32, i32
  }
  func.func @transform_3(%arg0: i32, %arg1: i32, %arg2: i32) -> (i32, i32) {
    %c0_i32 = arith.constant 0 : i32
    %c0_i32_0 = arith.constant 0 : i32
    %c0_i32_1 = arith.constant 0 : i32
    return %c0_i32, %c0_i32_0 : i32, i32
  }
  func.func @transform_4(%arg0: i32, %arg1: i32, %arg2: i32) -> (i32, i32, i32) {
    %c1_i32 = arith.constant 1 : i32
    %0 = arith.muli %arg1, %c1_i32 : i32
    %1 = arith.addi %0, %arg2 : i32
    %c0_i32 = arith.constant 0 : i32
    %c0_i32_0 = arith.constant 0 : i32
    return %arg0, %1, %c0_i32 : i32, i32, i32
  }
}

</mosaic_0001>

<bundles_post_ra>
// kernel: tpu_custom_call.1
= control target key start
LH: loop header
LB: loop body
LE: loop exit
PB: predicated region body
PF: predicated region fallthrough
CT: control target
= control target key end

     0   :  { %s1909_s0 = inlined_call_operand.hbm [shape: f32[2,16,128], index: 0, kind: input, shape index: {}]   ;;  %s1910_s1 = inlined_call_operand.hbm [shape: f32[2,8,128], index: 1, kind: input, shape index: {}]   ;;  %s1911_s2 = inlined_call_operand.hbm [shape: f32[2,8,128], index: 2, kind: input, shape index: {}]   ;;  %s1912_s3 = inlined_call_operand.hbm [shape: f32[128,128], index: 3, kind: input, shape index: {}]   ;;  %s1913_s4 = inlined_call_operand.hbm [shape: f32[2,16,128], index: 4, kind: output, shape index: {}]  }
   0x1   :  { %1920 = sst [smem:[#allocation20_spill]] %s1909_s0 }
   0x2   :  { %1921 = sst [smem:[#allocation21_spill]] %s1910_s1 }
   0x3   :  { %1922 = sst [smem:[#allocation22_spill]] %s1911_s2 }
   0x4   :  { %9 = vsyncpa [#allocation4], 0 }
   0x5   :  { %11 = vsyncpa [#allocation4 + $0x1], 0 }
   0x6   :  { %12 = vsyncpa [#allocation7], 0 }
   0x7   :  { %14 = vsyncpa [#allocation7 + $0x1], 0 }
   0x8   :  { %15 = vsyncpa [#allocation10], 0 }
   0x9   :  { %16 = vsyncpa [#allocation5], 0 }
   0xa   :  { %18 = vsyncpa [#allocation5 + $0x1], 0  ;;  %s1644_s15 = smov 0   ;;  %s1646_s16 = smov 0  }
   0xb   :  { %s1648_s17 = smov 0   ;;  %s1650_s18 = smov 0  }
   0xc   :  { %s1652_s19 = smov 0   ;;  %s1654_s20 = smov 0  }
   0xd LB: > { %1923 = sst [smem:[#allocation16_spill]] %s1595_s17  ;;  %s43_s21 = sadd.s32 1, %s1603_s19  ;;  %s1607_s20 = sphi %s1654_s20, %s24_s20   ;;  %s1603_s19 = sphi %s1652_s19, %s1946_s19   ;;  %s1599_s18 = sphi %s1650_s18, %s1945_s18   ;;  %s1595_s17 = sphi %s1648_s17, %s1944_s17   ;;  %s1591_s16 = sphi %s1646_s16, %s1948_s16   ;;  %s1587_s15 = sphi %s1644_s15, %s1947_s15  }
   0xe   : > { %1924 = sst [smem:[#allocation17_spill]] %s1603_s19  ;;  %s54_s22 = sadd.s32 1, %s1595_s17 }
   0xf   : > { %p45_p0 = scmp.ge.s32.totalorder %s43_s21, 2  ;;  %p61_p1 = scmp.ne.s32.totalorder %s1595_s17, %s1591_s16 }
  0x10   : > { %p62_p2 = scmp.eq.s32.totalorder %s1607_s20, 0  ;;  %p1315_p5 = scmp.lt.s32.totalorder %s1607_s20, 2 }
  0x11   : > { %s1950_s21 = smov (%p45_p0, %s43_s21), 0  ;;  %s1689_s24 = sand.u32 1, %s1595_s17  }
  0x12   : > { %1925 = sst [smem:[#allocation18_spill]] %s1950_s21  ;;  %p63_p4 = por %p62_p2, %p61_p1 }
  0x13   : > { %s49_s23 = ssub.s32 %s1603_s19, %s1950_s21  ;;  %s231_s26 = sand.u32 1, %s1607_s20  }
  0x14   : > { %p52_p6 = scmp.eq.s32.totalorder %s49_s23, 0  ;;  %p1691_p7 = pnand %p1315_p5, %p63_p4 }
  0x15   : > { %s1914_s27 = sshll.u32 %s1689_s24, 3  ;;  %s1152_s29 = sshll.u32 %s1603_s19, 7 }
  0x16   : > { %s1698_s28 = scalar_select %p52_p6, %s1595_s17, %s54_s22  }
  0x17   : > { %s1928_s1 = sld [smem:[#allocation21_spill]]  ;;  %s235_s7 = scalar_lea.vmem [#allocation6], %s1914_s27 }
  0x18   : > { %1927 = sst [smem:[#allocation19_spill]] %s1698_s28  ;;  %s242_s8 = sshll.u32 %s235_s7, 4  ;;  %s243_s8 = int_to_ptr.vmem [resolvable:$true] %s242_s8 }
  0x19   : > { %s1706_s9 = scalar_lea.sflag [#allocation7], %s231_s26  ;;  %p1916_p8 = pneg %p1691_p7 }
  0x1a   : > { %s1422_s10 = scalar_lea.vmem %s243_s8, 128  ;;  %s1609_s11 = smov [#allocation6]  }
  0x1b   : > { %p1423_p9 = scmp.ne.s32.totalorder %s243_s8, %s1422_s10  ;;  %s1427_s12 = sshll.u32 %s1609_s11, 4  ;;  %s1428_s12 = int_to_ptr.vmem [resolvable:$false] %s1427_s12 }
  0x1c   : > { %s1429_s13 = scalar_lea.vmem %s1428_s12, 256  ;;  %p1430_p12 = scmp.lt.s32.totalorder %s243_s8, %s1428_s12 }
  0x1d   : > { %s240_s6 = scalar_lea.hbm %s1928_s1, %s1152_s29  ;;  %p1425_p10 = pnand %p1423_p9, %p1916_p8 }
  0x1e   : > { %p1431_p13 = scmp.lt.s32.totalorder %s1429_s13, %s1422_s10 }
  0x1f   : > { %p1426_p11 = pneg %p1425_p10 }
  0x20   : > { %p1432_p0 = por %p1431_p13, %p1430_p12 }
  0x22   : > { %p1433_p2 = pnand %p1432_p0, %p1426_p11 }
  0x24   : > { %1436 = shalt.err (!%p1433_p2)
}
  0x25   : > { %1306 = dma.hbm_to_vmem [thread:$0]  (!%p1691_p7), %s240_s6, 128, %s243_s8, %s1706_s9  }
  0x26   : > { %s1929_s2 = sld [smem:[#allocation22_spill]]  ;;  %s1722_s26 = sadd.s32 4294967295, %s1607_s20  }
  0x27   : > { %s1144_s30 = sadd.s32 4294967294, %s1607_s20   ;;  %p67_p4 = scmp.ne.s32.totalorder %s1591_s16, %s1587_s15 }
  0x28   : > { %p1915_p5 = scmp.eq.s32.totalorder %s1722_s26, 0  ;;  %p168_p6 = scmp.eq.s32.totalorder %s1722_s26, 1 }
  0x29   : > { %p174_p9 = scmp.eq.s32.totalorder %s1144_s30, 1  ;;  %p1145_p10 = scmp.ge.s32.totalorder %s1607_s20, 1 }
  0x2a   : > { %p1732_p11 = por %p1915_p5, %p67_p4  ;;  %p1739_p12 = por %p168_p6, %p61_p1 }
  0x2b   : > { %p1743_p13 = por %p174_p9, %p67_p4  ;;  %p181_p0 = scmp.lt.s32.totalorder %s1607_s20, 3 }
  0x2c   : > { %s1719_s23 = scalar_lea.hbm %s1929_s2, %s1152_s29  ;;  %s1610_s8 = smov [#allocation9]  }
  0x2d   : > { %s1932_s6 = scalar_select %p1743_p13, 1, 0 }
  0x2e   : > { %p1748_p2 = pnand %p1145_p10, %p181_p0  ;;  %s193_s10 = sshll.u32 %s1610_s8, 4  ;;  %s194_s10 = int_to_ptr.vmem [resolvable:$true] %s193_s10 }
  0x2f   : > { %s1148_s11 = sshll.u32 %s1689_s24, 4  ;;  %s1222_s13 = sshll.u32 %s1603_s19, 8 }
  0x30   : > { %p1296_p3 = pneg %p1748_p2  ;;  %s211_s14 = scalar_lea.vmem [#allocation3], %s1148_s11 }
  0x31   : > { %s221_s22 = sshll.u32 %s211_s14, 4  ;;  %s1935_s0 = sld [smem:[#allocation20_spill]]  ;;  %s222_s22 = int_to_ptr.vmem [resolvable:$true] %s221_s22 }
  0x32   : > { %p1757_p1 = pnand %p1296_p3, %p1915_p5  ;;  %s1448_s8 = scalar_lea.vmem %s194_s10, 2048 }
  0x33   : > { %p1449_p6 = scmp.ne.s32.totalorder %s194_s10, %s1448_s8  ;;  %p1456_p0 = scmp.lt.s32.totalorder %s194_s10, %s194_s10 }
  0x34   : > { %p1439_p4 = pneg %p1757_p1  ;;  %p1457_p3 = scmp.lt.s32.totalorder %s1448_s8, %s1448_s8 }
  0x36   : > { %p1451_p9 = pnand %p1449_p6, %p1439_p4  ;;  %p1458_p5 = por %p1457_p3, %p1456_p0 }
  0x37   : > { %s1765_s1 = scalar_lea.hbm %s1935_s0, %s1222_s13 }
  0x38   : > { %p1452_p10 = pneg %p1451_p9 }
  0x3a   : > { %p1459_p8 = pnand %p1458_p5, %p1452_p10 }
  0x3c   : > { %1462 = shalt.err (!%p1459_p8)
}
  0x3d   : > { %s1611_s2 = smov 128   ;;  %s1612_s11 = smov 8  }
  0x3e   : > { %1299 = dma.hbm_to_vmem [thread:$0]  (!%p1757_p1), %s1912_s3, 2048, %s194_s10, [#allocation10], %s1611_s2, %s1611_s2, %s1612_s11  }
  0x3f   : > { %s1936_s14 = sshll.u32 %s1689_s24, 3  ;;  %s208_s21 = scalar_lea.sflag [#allocation4], %s1689_s24 }
  0x40   : > { %s253_s30 = scalar_lea.vmem [#allocation8], %s1936_s14  ;;  %s1476_s8 = scalar_lea.vmem %s222_s22, 256 }
  0x41   : > { %s260_s0 = sshll.u32 %s253_s30, 4  ;;  %p1477_p4 = scmp.ne.s32.totalorder %s222_s22, %s1476_s8  ;;  %s261_s0 = int_to_ptr.vmem [resolvable:$true] %s260_s0 }
  0x42   : > { %p1937_p8 = pneg %p1691_p7  ;;  %s1613_s19 = smov [#allocation3]  }
  0x43   : > { %s1481_s28 = sshll.u32 %s1613_s19, 4  ;;  %s1482_s28 = int_to_ptr.vmem [resolvable:$false] %s1481_s28 }
  0x44   : > { %p1479_p5 = pnand %p1477_p4, %p1937_p8  ;;  %s1483_s17 = scalar_lea.vmem %s1482_s28, 512 }
  0x45   : > { %p1484_p9 = scmp.lt.s32.totalorder %s222_s22, %s1482_s28  ;;  %p1485_p10 = scmp.lt.s32.totalorder %s1483_s17, %s1476_s8 }
  0x46   : > { %p1480_p6 = pneg %p1479_p5 }
  0x47   : > { %p1486_p0 = por %p1485_p10, %p1484_p9 }
  0x49   : > { %p1487_p3 = pnand %p1486_p0, %p1480_p6 }
  0x4b   : > { %1490 = shalt.err (!%p1487_p3)
}
  0x4c   : > { %1303 = dma.hbm_to_vmem [thread:$0]  (!%p1691_p7), %s1765_s1, 256, %s222_s22, %s208_s21, %s1611_s2, %s1611_s2, %s1612_s11  }
  0x4d   : > { %s1504_s24 = scalar_lea.vmem %s261_s0, 128  ;;  %p1938_p4 = pmov %p1937_p8 }
  0x4e   : > { %p1505_p1 = scmp.ne.s32.totalorder %s261_s0, %s1504_s24  ;;  %s1614_s19 = smov [#allocation8]  }
  0x4f   : > { %s1509_s10 = sshll.u32 %s1614_s19, 4  ;;  %s1510_s10 = int_to_ptr.vmem [resolvable:$false] %s1509_s10 }
  0x50   : > { %p1507_p8 = pnand %p1505_p1, %p1938_p4  ;;  %s1511_s28 = scalar_lea.vmem %s1510_s10, 256 }
  0x51   : > { %p1512_p13 = scmp.lt.s32.totalorder %s261_s0, %s1510_s10  ;;  %p1513_p9 = scmp.lt.s32.totalorder %s1511_s28, %s1504_s24 }
  0x52   : > { %p1508_p5 = pneg %p1507_p8 }
  0x53   : > { %p1514_p6 = por %p1513_p9, %p1512_p13 }
  0x55   : > { %p1515_p10 = pnand %p1514_p6, %p1508_p5 }
  0x57   : > { %1518 = shalt.err (!%p1515_p10)
}
  0x58   : > { %1309 = dma.hbm_to_vmem [thread:$0]  (!%p1691_p7), %s1719_s23, 128, %s261_s0, %s1706_s9  }
  0x59   : > { %269 = sbr.rel (%p1748_p2) target bundleno = 739 (0x2e3), region = 36  ;;  %s1793_s1 = sand.u32 (!%p1748_p2), 1, %s1591_s16  }
  0x5a   : > { %s1156_s2 = sshll.u32 (!%p1748_p2), %s1793_s1, 4  ;;  %s272_s17 = scalar_lea.sflag (!%p1748_p2), [#allocation4], %s1793_s1 }
  0x5b   : > { %s1799_s21 = scalar_lea.vmem (!%p1748_p2), [#allocation3], %s1156_s2 }
  0x5e   : > { %1570 = dma.done.wait (%p1732_p11), %s272_s17, 256  }
  0x5f   : > { %1572 = vsyncadd (%p1732_p11), %s272_s17, 4294967040  ;;  %s280_s0 = sand.u32 1, %s1722_s26   ;;  %s1157_s25 = sshll.u32 %s1793_s1, 3 }
  0x60   : > { %s281_s9 = scalar_lea.sflag [#allocation7], %s280_s0  ;;  %s284_s23 = scalar_lea.vmem [#allocation6], %s1157_s25 }
  0x61   : > { %1574 = dma.done.wait (%p1732_p11), %s281_s9, 256  }
  0x62   : > { %1576 = vsyncadd (%p1732_p11), %s281_s9, 4294967040  ;;  %s293_s7 = scalar_lea.vmem [#allocation8], %s1157_s25  ;;  %p1939_p7 = scmp.eq.s32.totalorder %s1722_s26, 0 }
  0x64   : > { %1578 = dma.done.wait (%p1939_p7), [#allocation10], 2048   ;;  %p1940_p13 = pmov %p1939_p7 }
  0x65   : > { %v341_v0 = vld [vmem:[%s284_s23] sm:$0xff]  ;;  %v387_v1 = vld [vmem:[%s293_s7] sm:$0xff]  ;;  %vm430_vm0 = vcmask 1043456   ;;  %v1615_v16 = vmov 0   ;;  %vm405_vm2 = vcmask 64512   ;;  %s1255_s26 = sshll.u32 %s1599_s18, 8 }
  0x66   : > { %1580 = vsyncadd (%p1940_p13), [#allocation10], 4294965248  ;;  %v344_v2 = vmul.f32 1.442695, %v341_v0  ;;  %v388_v3 = vpack.c.bf16 %v387_v1, %v387_v1  ;;  %v343_v5 = vadd.f32 1.0, %v341_v0  ;;  %vm342_vm1 = vcmp.gt.f32.partialorder %v341_v0, 0.0  ;;  %1373 = vset.pattern.permute.xlu1 %v1615_v16  ;;  %960 = vmatprep.mubr.bf16.mxu1 %v1615_v16  ;;  %s1859_s27 = scalar_lea.hbm %s1913_s4, %s1255_s26 }
  0x67   : > { %v1823_v41 = vld [vmem:[#allocation9 + $0x10] sm:$0xff]  ;;  %v1825_v43 = vld [vmem:[#allocation9] sm:$0xff]  ;;  %v1828_v46 = vld [vmem:[#allocation9 + $0x18] sm:$0xff]  ;;  %s331_s5 = scalar_lea.vmem [#allocation11], %s1156_s2  ;;  %s982_s13 = scalar_lea.sflag [#allocation5], %s1793_s1 }
  0x68   : > { %1399 = vpow2.f32 %v344_v2  ;;  %1283 = vmatprep.subr.msk.bf16.mxu0 %vm430_vm0, %v388_v3  ;;  %v432_v4 = vsel %vm430_vm0, %v388_v3, 0  ;;  %v1831_v50 = vld [vmem:[#allocation9 + $0x8] sm:$0xff]  ;;  %v1834_v54 = vld [vmem:[#allocation9 + $0x30] sm:$0xff]  ;;  %v1837_v58 = vld [vmem:[#allocation9 + $0x20] sm:$0xff]  ;;  %s998_s12 = sshll.u32 %s331_s5, 4  ;;  %s1616_s18 = smov [#allocation11]   ;;  %s1861_s12 = int_to_ptr.vmem [resolvable:$true] %s998_s12 }
  0x69   : > { %1266 = vmatpush3.bf16.msra.mxu0 %v432_v4  ;;  %v538_v62 = vld [vmem:[#allocation9 + $0x38] sm:$0xff]  ;;  %v1841_v2 = vld [vmem:[#allocation9 + $0x28] sm:$0xff]  ;;  %s1519_s14 = scalar_lea.vmem %s1861_s12, 256  ;;  %s1523_s30 = sshll.u32 %s1616_s18, 4  ;;  %s1524_s30 = int_to_ptr.vmem [resolvable:$false] %s1523_s30 }
  0x6a   : > { %p1520_p11 = scmp.ne.s32.totalorder %s1861_s12, %s1519_s14  ;;  %s1525_s8 = scalar_lea.vmem %s1524_s30, 512 }
  0x6b   : > { %p1526_p3 = scmp.lt.s32.totalorder %s1861_s12, %s1524_s30  ;;  %p1527_p1 = scmp.lt.s32.totalorder %s1525_s8, %s1519_s14 }
  0x6c   : > { %p1521_p2 = pnand %p1520_p11, %p1739_p12 }
  0x6d   : > { %p1528_p4 = por %p1527_p1, %p1526_p3 }
  0x6e   : > { %p1522_p0 = pneg %p1521_p2 }
  0x70   : > { %p1529_p8 = pnand %p1528_p4, %p1522_p0 }
  0x75   : > { %v1400_v6 = vpop.eup %1399 }
  0x76   : > { %v346_v7 = vsel %vm342_vm1, %v343_v5, %v1400_v6 }
  0x77   : > { %v386_v8 = vpack.c.bf16 %v346_v7, %v346_v7  ;;  %v347_v9 = vrot.slane %v346_v7, 4 }
  0x79   : > { %389 = vxpose.xlu0.c.b16.start.end [1/1] (short) %v386_v8, 128  ;;  %v348_v10 = vadd.f32 %v347_v9, %v346_v7  ;;  %v541_v8 = vld [vmem:[#allocation9 + $0x50] sm:$0xff] }
  0x7b   : > { %v349_v11 = vrot.slane %v348_v10, 2 }
  0x7d   : > { %v350_v12 = vadd.f32 %v349_v11, %v348_v10  ;;  %v539_v11 = vld [vmem:[#allocation9 + $0x40] sm:$0xff] }
  0x7f   : > { %v351_v13 = vrot.slane %v350_v12, 1 }
  0x81   : > { %v352_v14 = vadd.f32 %v351_v13, %v350_v12 }
  0x83   : > { %v353_v15 = vmul.f32 0.125, %v352_v14 }
  0x99   : > { %354 = vxpose.xlu0.b32.start.end [1/1] (short) %v353_v15, 128 }
  0xc2   : > { %1374 = vset.pattern.permute.xlu0 %v1615_v16 }
  0xdb   : > { %v397_v17 = vpop.trf.xlu0 }
  0xdc   : > { %1267 = vmatprep.mubr.msk.bf16.mxu0 %vm405_vm2, %v397_v17 }
  0xdf   : > { %v398_v18 = vpop.trf.xlu0 }
  0xe0   : > { %1268 = vmatmul.mubr.msk.bf16.vlgmr.msra.gmra.mxu0 %vm405_vm2, %v398_v18 }
  0xe3   : > { %v399_v19 = vpop.trf.xlu0 }
  0xe4   : > { %1271 = vmatprep.mubr.msk.bf16.mxu0 %vm405_vm2, %v399_v19  ;;  %v542_v19 = vld [vmem:[#allocation9 + $0x58] sm:$0xff] }
  0xe7   : > { %v400_v20 = vpop.trf.xlu0 }
  0xe8   : > { %1272 = vmatmul.mubr.msk.bf16.gmra.mxu0 %vm405_vm2, %v400_v20 }
  0xeb   : > { %v401_v21 = vpop.trf.xlu0 }
  0xec   : > { %1275 = vmatprep.mubr.msk.bf16.mxu0 %vm405_vm2, %v401_v21 }
  0xef   : > { %v402_v22 = vpop.trf.xlu0 }
  0xf0   : > { %1276 = vmatmul.mubr.msk.bf16.gmra.mxu0 %vm405_vm2, %v402_v22  ;;  %v540_v22 = vld [vmem:[#allocation9 + $0x48] sm:$0xff] }
  0xf3   : > { %v403_v23 = vpop.trf.xlu0 }
  0xf4   : > { %1279 = vmatprep.mubr.msk.bf16.mxu0 %vm405_vm2, %v403_v23 }
  0xf7   : > { %v404_v24 = vpop.trf.xlu0 }
  0xf8   : > { %1280 = vmatmul.mubr.msk.bf16.gmra.mxu0 %vm405_vm2, %v404_v24 }
 0x115   : > { %v370_v25 = vpop.trf.xlu0 }
 0x119   : > { %v371_v26 = vpop.trf.xlu0 }
 0x11d   : > { %v372_v27 = vpop.trf.xlu0 }
 0x121   : > { %v373_v28 = vpop.trf.xlu0 }
 0x125   : > { %v374_v29 = vpop.trf.xlu0 }
 0x129   : > { %v375_v30 = vpop.trf.xlu0 }
 0x12d   : > { %v376_v31 = vpop.trf.xlu0 }
 0x131   : > { %v377_v32 = vpop.trf.xlu0 }
 0x132   : > { %680 = vperm.xlu0 %1374, %v377_v32  }
 0x135   : > { %v378_v33 = vpop.trf.xlu0 }
 0x136   : > { %685 = vperm.xlu1 %1373, %v378_v33  }
 0x139   : > { %v379_v34 = vpop.trf.xlu0 }
 0x13a   : > { %690 = vperm.xlu1 %1373, %v379_v34  }
 0x13d   : > { %v380_v35 = vpop.trf.xlu0 }
 0x13e   : > { %695 = vperm.xlu1 %1373, %v380_v35   ;;  %v543_v35 = vld [vmem:[#allocation9 + $0x60] sm:$0xff] }
 0x141   : > { %v381_v36 = vpop.trf.xlu0 }
 0x142   : > { %700 = vperm.xlu1 %1373, %v381_v36  }
 0x145   : > { %v382_v37 = vpop.trf.xlu0 }
 0x146   : > { %705 = vperm.xlu1 %1373, %v382_v37  }
 0x149   : > { %v383_v38 = vpop.trf.xlu0 }
 0x14a   : > { %710 = vperm.xlu1 %1373, %v383_v38  }
 0x14d   : > { %v384_v39 = vpop.trf.xlu0 }
 0x14e   : > { %715 = vperm.xlu1 %1373, %v384_v39  }
 0x151   : > { %v385_v40 = vpop.trf.xlu0 }
 0x152   : > { %720 = vperm.xlu1 %1373, %v385_v40  }
 0x156   : > { %675 = vperm.xlu1 %1373, %v376_v31  }
 0x15a   : > { %665 = vperm.xlu1 %1373, %v374_v29  }
 0x15e   : > { %670 = vperm.xlu1 %1373, %v375_v30   ;;  %v545_v30 = vld [vmem:[#allocation9 + $0x70] sm:$0xff] }
 0x162   : > { %655 = vperm.xlu1 %1373, %v372_v27  }
 0x166   : > { %660 = vperm.xlu1 %1373, %v373_v28  }
 0x16a   : > { %645 = vperm.xlu1 %1373, %v370_v25  }
 0x16e   : > { %650 = vperm.xlu1 %1373, %v371_v26  }
 0x1a0   : > { %v1269_v42 = vpop.f32.mrf.mxu0 }
 0x1a1   : > { %v549_v44 = vmul.f32 %v1269_v42, %v1823_v41  ;;  %v546_v42 = vld [vmem:[#allocation9 + $0x78] sm:$0xff] }
 0x1a2   : > { %v468_v45 = vpop.f32.mrf.mxu0 }
 0x1a3   : > { %v1225_v47 = vpack.c.bf16 %v549_v44, %v549_v44  ;;  %v547_v48 = vmul.f32 %v1825_v43, %v468_v45 }
 0x1a4   : > { %v1270_v49 = vpop.f32.mrf.mxu0 }
 0x1a5   : > { %629 = vst [vmem:[#allocation2 + $0x10] sm:$0xf] %v1225_v47  ;;  %v1223_v51 = vpack.c.bf16 %v547_v48, %v547_v48  ;;  %v550_v52 = vmul.f32 %v1270_v49, %v1828_v46  ;;  %v544_v49 = vld [vmem:[#allocation9 + $0x68] sm:$0xff] }
 0x1a6   : > { %v471_v53 = vpop.f32.mrf.mxu0 }
 0x1a7   : > { %627 = vst [vmem:[#allocation2] sm:$0xf] %v1223_v51  ;;  %v1226_v55 = vpack.c.bf16 %v550_v52, %v550_v52  ;;  %v548_v56 = vmul.f32 %v1831_v50, %v471_v53 }
 0x1a8   : > { %v1273_v57 = vpop.f32.mrf.mxu0 }
 0x1a9   : > { %630 = vst [vmem:[#allocation2 + $0x18] sm:$0xf] %v1226_v55  ;;  %v1224_v59 = vpack.c.bf16 %v548_v56, %v548_v56  ;;  %v553_v60 = vmul.f32 %v1273_v57, %v1834_v54 }
 0x1aa   : > { %v484_v61 = vpop.f32.mrf.mxu0 }
 0x1ab   : > { %628 = vst [vmem:[#allocation2 + $0x8] sm:$0xf] %v1224_v59  ;;  %v1229_v63 = vpack.c.bf16 %v553_v60, %v553_v60  ;;  %v551_v0 = vmul.f32 %v1837_v58, %v484_v61 }
 0x1ac   : > { %v1274_v1 = vpop.f32.mrf.mxu0 }
 0x1ad   : > { %633 = vst [vmem:[#allocation2 + $0x30] sm:$0xf] %v1229_v63  ;;  %v1227_v3 = vpack.c.bf16 %v551_v0, %v551_v0  ;;  %v554_v4 = vmul.f32 %v1274_v1, %v538_v62  ;;  %v681_v5 = vpop.permute.xlu0 %680 }
 0x1ae   : > { %v730_v6 = vmul.f32 %v681_v5, %v538_v62  ;;  %v487_v7 = vpop.f32.mrf.mxu0 }
 0x1af   : > { %631 = vst [vmem:[#allocation2 + $0x20] sm:$0xf] %v1227_v3  ;;  %v1230_v9 = vpack.c.bf16 %v554_v4, %v554_v4  ;;  %v552_v10 = vmul.f32 %v1841_v2, %v487_v7 }
 0x1b0   : > { %v1246_v12 = vpack.c.bf16 %v730_v6, %v730_v6  ;;  %v1277_v13 = vpop.f32.mrf.mxu0 }
 0x1b1   : > { %634 = vst [vmem:[#allocation2 + $0x38] sm:$0xf] %v1230_v9  ;;  %v1228_v14 = vpack.c.bf16 %v552_v10, %v552_v10  ;;  %v557_v15 = vmul.f32 %v1277_v13, %v541_v8  ;;  %v686_v16 = vpop.permute.xlu1 %685 }
 0x1b2   : > { %810 = vst [vmem:[#allocation2 + $0x3c] sm:$0xf] %v1246_v12  ;;  %v731_v17 = vmul.f32 %v686_v16, %v539_v11  ;;  %v500_v18 = vpop.f32.mrf.mxu0 }
 0x1b3   : > { %632 = vst [vmem:[#allocation2 + $0x28] sm:$0xf] %v1228_v14  ;;  %v1233_v20 = vpack.c.bf16 %v557_v15, %v557_v15  ;;  %v555_v21 = vmul.f32 %v539_v11, %v500_v18 }
 0x1b4   : > { %v1247_v23 = vpack.c.bf16 %v731_v17, %v731_v17  ;;  %v1278_v24 = vpop.f32.mrf.mxu0 }
 0x1b5   : > { %637 = vst [vmem:[#allocation2 + $0x50] sm:$0xf] %v1233_v20  ;;  %v1231_v25 = vpack.c.bf16 %v555_v21, %v555_v21  ;;  %v558_v26 = vmul.f32 %v1278_v24, %v542_v19  ;;  %v691_v27 = vpop.permute.xlu1 %690 }
 0x1b6   : > { %811 = vst [vmem:[#allocation2 + $0x44] sm:$0xf] %v1247_v23  ;;  %v732_v28 = vmul.f32 %v691_v27, %v540_v22  ;;  %v503_v29 = vpop.f32.mrf.mxu0  ;;  %v819_v23 = vld [vmem:[%s1799_s21] sm:$0xff] }
 0x1b7   : > { %635 = vst [vmem:[#allocation2 + $0x40] sm:$0xf] %v1231_v25  ;;  %v1234_v31 = vpack.c.bf16 %v558_v26, %v558_v26  ;;  %v556_v32 = vmul.f32 %v540_v22, %v503_v29  ;;  %v825_v27 = vmul.f32 1.442695, %v819_v23  ;;  %vm821_vm3 = vcmp.gt.f32.partialorder %v819_v23, 0.0 }
 0x1b8   : > { %v1248_v33 = vpack.c.bf16 %v732_v28, %v732_v28  ;;  %v1281_v34 = vpop.f32.mrf.mxu0 }
 0x1b9   : > { %638 = vst [vmem:[#allocation2 + $0x58] sm:$0xf] %v1234_v31  ;;  %v1232_v36 = vpack.c.bf16 %v556_v32, %v556_v32  ;;  %v696_v37 = vpop.permute.xlu1 %695  ;;  %v561_v38 = vmul.f32 %v1281_v34, %v545_v30  ;;  %1401 = vpow2.f32 %v825_v27 }
 0x1ba   : > { %812 = vst [vmem:[#allocation2 + $0x4c] sm:$0xf] %v1248_v33  ;;  %v733_v39 = vmul.f32 %v696_v37, %v541_v8  ;;  %v516_v40 = vpop.f32.mrf.mxu0 }
 0x1bb   : > { %636 = vst [vmem:[#allocation2 + $0x48] sm:$0xf] %v1232_v36  ;;  %v1237_v44 = vpack.c.bf16 %v561_v38, %v561_v38  ;;  %v559_v45 = vmul.f32 %v543_v35, %v516_v40 }
 0x1bc   : > { %v1249_v47 = vpack.c.bf16 %v733_v39, %v733_v39  ;;  %v1282_v48 = vpop.f32.mrf.mxu0  ;;  %v1389_v39 = vld [vmem:[#allocation2 + $0x30] ss:$8 sps:$4 sm:$0xff]  }
 0x1bd   : > { %v701_v51 = vpop.permute.xlu1 %700  ;;  %641 = vst [vmem:[#allocation2 + $0x70] sm:$0xf] %v1237_v44  ;;  %v1235_v52 = vpack.c.bf16 %v559_v45, %v559_v45  ;;  %v562_v53 = vmul.f32 %v1282_v48, %v546_v42  ;;  %v1392_v44 = vld [vmem:[#allocation2 + $0x20] ss:$8 sps:$4 sm:$0xff]  }
 0x1be   : > { %813 = vst [vmem:[#allocation2 + $0x54] sm:$0xf] %v1249_v47  ;;  %v734_v55 = vmul.f32 %v701_v51, %v542_v19  ;;  %v519_v56 = vpop.f32.mrf.mxu0  ;;  %v1395_v51 = vld [vmem:[#allocation2 + $0x10] ss:$8 sps:$4 sm:$0xff]  }
 0x1bf   : > { %639 = vst [vmem:[#allocation2 + $0x60] sm:$0xf] %v1235_v52  ;;  %v1238_v57 = vpack.c.bf16 %v562_v53, %v562_v53  ;;  %v560_v59 = vmul.f32 %v544_v49, %v519_v56 }
 0x1c0   : > { %v1250_v60 = vpack.c.bf16 %v734_v55, %v734_v55  ;;  %v1383_v31 = vld [vmem:[#allocation2 + $0x50] ss:$8 sps:$4 sm:$0xff]   ;;  %v1398_v55 = vld [vmem:[#allocation2] ss:$8 sps:$4 sm:$0xff]  }
 0x1c1   : > { %v706_v61 = vpop.permute.xlu1 %705  ;;  %642 = vst [vmem:[#allocation2 + $0x78] sm:$0xf] %v1238_v57  ;;  %v1236_v62 = vpack.c.bf16 %v560_v59, %v560_v59  ;;  %v1384_v32 = vld [vmem:[#allocation2 + $0x44] ss:$8 sps:$4 sm:$0xff]  }
 0x1c2   : > { %814 = vst [vmem:[#allocation2 + $0x5c] sm:$0xf] %v1250_v60  ;;  %v735_v63 = vmul.f32 %v706_v61, %v543_v35  ;;  %v1386_v35 = vld [vmem:[#allocation2 + $0x40] ss:$8 sps:$4 sm:$0xff]  }
 0x1c3   : > { %640 = vst [vmem:[#allocation2 + $0x68] sm:$0xf] %v1236_v62 }
 0x1c4   : > { %v1251_v0 = vpack.c.bf16 %v735_v63, %v735_v63 }
 0x1c5   : > { %v711_v1 = vpop.permute.xlu1 %710 }
 0x1c6   : > { %815 = vst [vmem:[#allocation2 + $0x64] sm:$0xf] %v1251_v0  ;;  %v736_v3 = vmul.f32 %v711_v1, %v544_v49  ;;  %v1402_v47 = vpop.eup %1401 }
 0x1c8   : > { %v1252_v4 = vpack.c.bf16 %v736_v3, %v736_v3  ;;  %v1377_v19 = vld [vmem:[#allocation2 + $0x70] ss:$8 sps:$4 sm:$0xff]  }
 0x1c9   : > { %v716_v5 = vpop.permute.xlu1 %715 }
 0x1ca   : > { %816 = vst [vmem:[#allocation2 + $0x6c] sm:$0xf] %v1252_v4  ;;  %v737_v6 = vmul.f32 %v716_v5, %v545_v30  ;;  %v1380_v26 = vld [vmem:[#allocation2 + $0x60] ss:$8 sps:$4 sm:$0xff]  }
 0x1cc   : > { %v1253_v7 = vpack.c.bf16 %v737_v6, %v737_v6 }
 0x1cd   : > { %v721_v8 = vpop.permute.xlu1 %720 }
 0x1ce   : > { %817 = vst [vmem:[#allocation2 + $0x74] sm:$0xf] %v1253_v7  ;;  %v738_v9 = vmul.f32 %v721_v8, %v546_v42 }
 0x1d0   : > { %v1254_v10 = vpack.c.bf16 %v738_v9, %v738_v9 }
 0x1d1   : > { %v676_v11 = vpop.permute.xlu1 %675  ;;  %v1378_v21 = vld [vmem:[#allocation2 + $0x64] ss:$8 sps:$4 sm:$0xff]  }
 0x1d2   : > { %818 = vst [vmem:[#allocation2 + $0x7c] sm:$0xf] %v1254_v10  ;;  %v729_v12 = vmul.f32 %v676_v11, %v1834_v54  ;;  %v820_v54 = vld [vmem:[%s1799_s21 + $0x8] sm:$0xff] }
 0x1d3   : > { %v827_v29 = vmul.f32 1.442695, %v820_v54  ;;  %v824_v48 = vadd.f32 1.0, %v820_v54  ;;  %vm822_vm4 = vcmp.gt.f32.partialorder %v820_v54, 0.0 }
 0x1d4   : > { %v1245_v13 = vpack.c.bf16 %v729_v12, %v729_v12 }
 0x1d5   : > { %v666_v14 = vpop.permute.xlu1 %665  ;;  %1403 = vpow2.f32 %v827_v29 }
 0x1d6   : > { %809 = vst [vmem:[#allocation2 + $0x34] sm:$0xf] %v1245_v13  ;;  %v727_v15 = vmul.f32 %v666_v14, %v1837_v58  ;;  %v1381_v58 = vld [vmem:[#allocation2 + $0x54] ss:$8 sps:$4 sm:$0xff]  }
 0x1d8   : > { %v1243_v16 = vpack.c.bf16 %v727_v15, %v727_v15 }
 0x1d9   : > { %v671_v17 = vpop.permute.xlu1 %670  ;;  %v1375_v18 = vld [vmem:[#allocation2 + $0x74] ss:$8 sps:$4 sm:$0xff]  }
 0x1da   : > { %807 = vst [vmem:[#allocation2 + $0x24] sm:$0xf] %v1243_v16  ;;  %v728_v20 = vmul.f32 %v671_v17, %v1841_v2  ;;  %928 = vmatprep.subr.bf16.mxu1 %v1375_v18 }
 0x1db   : > { %929 = vmatpush1.bf16.msra.mxu1 %v1377_v19 }
 0x1dc   : > { %v1244_v22 = vpack.c.bf16 %v728_v20, %v728_v20  ;;  %930 = vmatprep.subr.bf16.mxu1 %v1378_v21 }
 0x1dd   : > { %v656_v24 = vpop.permute.xlu1 %655  ;;  %v1387_v36 = vld [vmem:[#allocation2 + $0x34] ss:$8 sps:$4 sm:$0xff]  }
 0x1de   : > { %808 = vst [vmem:[#allocation2 + $0x2c] sm:$0xf] %v1244_v22  ;;  %v725_v25 = vmul.f32 %v656_v24, %v1823_v41 }
 0x1df   : > { %931 = vmatpush1.bf16.msra.mxu1 %v1380_v26 }
 0x1e0   : > { %v1241_v28 = vpack.c.bf16 %v725_v25, %v725_v25  ;;  %932 = vmatprep.subr.bf16.mxu1 %v1381_v58 }
 0x1e1   : > { %v661_v30 = vpop.permute.xlu1 %660 }
 0x1e2   : > { %805 = vst [vmem:[#allocation2 + $0x14] sm:$0xf] %v1241_v28  ;;  %v726_v2 = vmul.f32 %v661_v30, %v1828_v46  ;;  %v1404_v49 = vpop.eup %1403 }
 0x1e3   : > { %933 = vmatpush1.bf16.msra.mxu1 %v1383_v31 }
 0x1e4   : > { %v1242_v33 = vpack.c.bf16 %v726_v2, %v726_v2  ;;  %934 = vmatprep.subr.bf16.mxu1 %v1384_v32 }
 0x1e5   : > { %v646_v34 = vpop.permute.xlu1 %645  ;;  %v1390_v40 = vld [vmem:[#allocation2 + $0x24] ss:$8 sps:$4 sm:$0xff]  }
 0x1e6   : > { %806 = vst [vmem:[#allocation2 + $0x1c] sm:$0xf] %v1242_v33  ;;  %v723_v41 = vmul.f32 %v646_v34, %v1825_v43  ;;  %v823_v43 = vadd.f32 1.0, %v819_v23 }
 0x1e7   : > { %935 = vmatpush1.bf16.msra.mxu1 %v1386_v35 }
 0x1e8   : > { %v1239_v37 = vpack.c.bf16 %v723_v41, %v723_v41  ;;  %936 = vmatprep.subr.bf16.mxu1 %v1387_v36  ;;  %v829_v52 = vsel %vm821_vm3, %v823_v43, %v1402_v47 }
 0x1e9   : > { %v651_v38 = vpop.permute.xlu1 %650 }
 0x1ea   : > { %803 = vst [vmem:[#allocation2 + $0x4] sm:$0xf] %v1239_v37  ;;  %v724_v46 = vmul.f32 %v651_v38, %v1831_v50  ;;  %v830_v50 = vsel %vm822_vm4, %v824_v48, %v1404_v49 }
 0x1eb   : > { %937 = vmatpush1.bf16.msra.mxu1 %v1389_v39  ;;  %v831_v56 = vpack.c.bf16 %v830_v50, %v829_v52 }
 0x1ec   : > { %v1240_v42 = vpack.c.bf16 %v724_v46, %v724_v46  ;;  %938 = vmatprep.subr.bf16.mxu1 %v1390_v40 }
 0x1ed   : > { %v1393_v45 = vld [vmem:[#allocation2 + $0x14] ss:$8 sps:$4 sm:$0xff]  }
 0x1ee   : > { %804 = vst [vmem:[#allocation2 + $0xc] sm:$0xf] %v1240_v42 }
 0x1ef   : > { %939 = vmatpush1.bf16.msra.mxu1 %v1392_v44 }
 0x1f0   : > { %940 = vmatprep.subr.bf16.mxu1 %v1393_v45 }
 0x1f3   : > { %941 = vmatpush1.bf16.msra.mxu1 %v1395_v51 }
 0x1f5   : > { %v1396_v53 = vld [vmem:[#allocation2 + $0x4] ss:$8 sps:$4 sm:$0xff]  }
 0x1f6   : > { %942 = vmatprep.subr.bf16.mxu1 %v1396_v53 }
 0x1f7   : > { %943 = vmatpush1.bf16.msra.mxu1 %v1398_v55 }
 0x1fa   : > { %961 = vmatmul.mubr.bf16.vlgmr.msra.gmra.mxu1 %v831_v56 }
 0x2ba   : > { %v962_v57 = vpop.f32.mrf.mxu1 }
 0x2bc   : > { %v964_v59 = vpop.f32.mrf.mxu1 }
 0x2bd   : > { %v971_v60 = vmul.f32 8.0, %v964_v59 }
 0x2be   : > { %v966_v61 = vpop.f32.mrf.mxu1 }
 0x2bf   : > { %v973_v62 = vadd.f32 1e-06, %v971_v60 }
 0x2c0   : > { %v968_v63 = vpop.f32.mrf.mxu1 }
 0x2c1   : > { %1405 = vrcp.f32 %v973_v62  ;;  %v972_v0 = vmul.f32 8.0, %v968_v63 }
 0x2c3   : > { %v974_v1 = vadd.f32 1e-06, %v972_v0 }
 0x2c5   : > { %1407 = vrcp.f32 %v974_v1 }
 0x2ce   : > { %v1406_v3 = vpop.eup %1405 }
 0x2cf   : > { %v977_v4 = vmul.f32 %v1406_v3, %v962_v57 }
 0x2d1   : > { %979 = vst [vmem:[%s331_s5] sm:$0xff] %v977_v4 }
 0x2d2   : > { %v1408_v5 = vpop.eup %1407 }
 0x2d3   : > { %v978_v6 = vmul.f32 %v1408_v5, %v966_v61 }
 0x2d5   : > { %980 = vst [vmem:[%s331_s5 + $0x8] sm:$0xff] %v978_v6 }
 0x2d6   : > { %1532 = shalt.err (!%p1529_p8)
}
 0x2d7   : > { %s1533_s24 = scalar_lea.hbm %s1859_s27, 256  ;;  %s1537_s28 = scalar_lea.hbm %s1913_s4, 512 }
 0x2d8   : > { %p1534_p5 = scmp.ne.s32.totalorder %s1859_s27, %s1533_s24  ;;  %p1538_p10 = scmp.lt.s32.totalorder %s1859_s27, %s1913_s4 }
 0x2d9   : > { %p1539_p7 = scmp.lt.s32.totalorder %s1537_s28, %s1533_s24 }
 0x2da   : > { %p1535_p9 = pnand %p1534_p5, %p1739_p12 }
 0x2db   : > { %p1540_p13 = por %p1539_p7, %p1538_p10 }
 0x2dc   : > { %p1536_p6 = pneg %p1535_p9 }
 0x2de   : > { %p1541_p11 = pnand %p1540_p13, %p1536_p6 }
 0x2e0   : > { %1544 = shalt.err (!%p1541_p11)
}
 0x2e1   : > { %s1617_s21 = smov 128   ;;  %s1618_s0 = smov 8  }
 0x2e2   : > { %1294 = dma.vmem_to_hbm [thread:$0]  (%p1739_p12), %s1861_s12, 256, %s1859_s27, %s982_s13, %s1617_s21, %s1617_s21, %s1618_s0  }
 0x2e3 PF: > { %s1013_s25 = sand.u32 1, %s1587_s15   ;;  %p1941_p2 = scmp.ne.s32.totalorder %s1932_s6, 0 }
 0x2e4   : > { %p1942_p0 = scmp.ge.s32.totalorder %s1607_s20, 2  ;;  %s1014_s9 = scalar_lea.sflag [#allocation5], %s1013_s25 }
 0x2e6   : > { %p1311_p3 = pnand %p1942_p0, %p1941_p2 }
 0x2e8   : > { %p1312_p1 = pneg %p1311_p3 }
 0x2ea   : > { %1582 = dma.done.wait (%p1312_p1), %s1014_s9, 256  }
 0x2eb   : > { %1584 = vsyncadd (%p1312_p1), %s1014_s9, 4294967040  ;;  %s24_s20 = sadd.s32 1, %s1607_s20   ;;  %s1943_s23 = sld [smem:[#allocation16_spill]] }
 0x2ec   : > { %p21_p4 = scmp.ge.s32.totalorder %s24_s20, 4   ;;  %s1944_s17 = sld [smem:[#allocation19_spill]] }
 0x2ed   : > { %s1945_s18 = sld [smem:[#allocation17_spill]]  ;;  %s1947_s15 = smov %s1591_s16 }
 0x2ee   : > { %s1946_s19 = sld [smem:[#allocation18_spill]]  ;;  %23 = sbr.rel (!%p21_p4) target bundleno = 13 (0xd), region = 113 }
 0x2f1   : > { %s1948_s16 = smov %s1943_s23 }
 0x2f3   :  { %1019 = vsyncpa [#allocation4], 1 }
 0x2f4   :  { %1021 = vsyncpa [#allocation4 + $0x1], 1 }
 0x2f5   :  { %1022 = vsyncpa [#allocation7], 1 }
 0x2f6   :  { %1024 = vsyncpa [#allocation7 + $0x1], 1 }
 0x2f7   :  { %1025 = vsyncpa [#allocation10], 1 }
 0x2f8   :  { %1026 = vsyncpa [#allocation5], 1 }
 0x2f9   :  { %1028 = vsyncpa [#allocation5 + $0x1], 1 }

</bundles_post_ra>
